<compile_context>
chip_gen: v5e
topology: v5e:2x2
jax: 0.10.0
libtpu: 0.0.40
codegen_flags: <defaults>
</compile_context>

<pallas_src>
import functools

import jax
import jax.numpy as jnp
from jax import lax
from jax.experimental import pallas as pl
from jax.experimental.pallas import tpu as pltpu


def _distill_kl_kernel(ys_ref, yt_ref, out_ref, *, inv_t, tile_rows, batch):
    i = pl.program_id(0)

    # Load tile, cast to f32, scale by 1/T (multiply, not divide).
    ys = ys_ref[...].astype(jnp.float32) * inv_t
    yt = yt_ref[...].astype(jnp.float32) * inv_t

    # Mask rows beyond the true batch (last tile may be padded / OOB garbage).
    row_id = i * tile_rows + lax.broadcasted_iota(jnp.int32, (tile_rows, 1), 0)
    valid = row_id < batch                      # (TB, 1) bool
    ys = jnp.where(valid, ys, 0.0)
    yt = jnp.where(valid, yt, 0.0)

    # Shifted softmax statistics over the class (lane) axis.
    ys_shift = ys - jnp.max(ys, axis=1, keepdims=True)
    z_s = jnp.sum(jnp.exp(ys_shift), axis=1, keepdims=True)
    log_z_s = jnp.log(z_s)

    yt_shift = yt - jnp.max(yt, axis=1, keepdims=True)
    exp_t = jnp.exp(yt_shift)
    z_t = jnp.sum(exp_t, axis=1, keepdims=True)
    log_z_t = jnp.log(z_t)

    # Fused per-row KL: sum(exp_t*(yt_shift - ys_shift))/z_t + (log_z_s - log_z_t)
    row_dot = jnp.sum(exp_t * (yt_shift - ys_shift), axis=1, keepdims=True)
    kl_rows = row_dot / z_t + (log_z_s - log_z_t)          # (TB, 1)
    kl_rows = kl_rows * valid.astype(jnp.float32)

    partial = jnp.sum(kl_rows)                              # scalar for this tile

    # Lane-dense (8, 128) output slab per grid step: partial at [0, 0], zeros
    # elsewhere; wrapper sums everything.  Keeps stores unmasked and lets the
    # grid axis be "parallel" (no reduction-carried output).
    r = lax.broadcasted_iota(jnp.int32, (8, 128), 0)
    c = lax.broadcasted_iota(jnp.int32, (8, 128), 1)
    out_ref[...] = jnp.where((r == 0) & (c == 0), partial, 0.0)


def _choose_tile_rows(batch, num_classes):
    """Batch-tile height sized for ~20 MiB of double-buffered f32 inputs."""
    budget_bytes = 20 * 1024 * 1024
    # 2 inputs x 2 pipeline buffers x tile_rows x C x 4 B
    tb = budget_bytes // (4 * 4 * num_classes)
    tb = max(8, min(1024, tb))
    tb = (tb // 8) * 8
    if tb >= batch:
        return batch              # single full-batch tile (block == full dim)
    return tb


def distill_kl(y_s, y_t, temperature, block_rows=None):
    """KL distillation loss. y_s, y_t: (B, C) logits. Returns scalar f32."""
    assert y_s.shape == y_t.shape and y_s.ndim == 2
    B, C = y_s.shape
    T = float(temperature)

    tb = block_rows if block_rows is not None else _choose_tile_rows(B, C)
    g = pl.cdiv(B, tb)

    kernel = functools.partial(
        _distill_kl_kernel, inv_t=1.0 / T, tile_rows=tb, batch=B
    )

    partials = pl.pallas_call(
        kernel,
        out_shape=jax.ShapeDtypeStruct((g * 8, 128), jnp.float32),
        grid=(g,),
        in_specs=[
            pl.BlockSpec((tb, C), lambda i: (i, 0)),
            pl.BlockSpec((tb, C), lambda i: (i, 0)),
        ],
        out_specs=pl.BlockSpec((8, 128), lambda i: (i, 0)),
        compiler_params=pltpu.CompilerParams(
            dimension_semantics=("parallel",),
        ),
    )(y_s, y_t)

    # Tiny final reduction + PyTorch scaling (T^2 / batch) in the wrapper.
    return jnp.sum(partials) * (T * T) / B


def _distill_kl_ref(y_s, y_t, temperature):
    """Pure-JAX reference for sanity checking."""
    T = float(temperature)
    log_p_s = jax.nn.log_softmax(y_s.astype(jnp.float32) / T, axis=1)
    p_t = jax.nn.softmax(y_t.astype(jnp.float32) / T, axis=1)
    log_p_t = jax.nn.log_softmax(y_t.astype(jnp.float32) / T, axis=1)
    kl_sum = jnp.sum(p_t * (log_p_t - log_p_s))
    return kl_sum * T * T / y_s.shape[0]


if __name__ == "__main__":
    T = 4.0  # typical distillation temperature

    key = jax.random.PRNGKey(0)
    k1, k2 = jax.random.split(key)

    # Small (batch, num_classes) logits. B intentionally not a multiple of the
    # forced tile size below so the partial-tile masking path is exercised.
    B, C = 50, 384
    y_s = jax.random.normal(k1, (B, C), dtype=jnp.float32)
    y_t = jax.random.normal(k2, (B, C), dtype=jnp.float32)

    ref = _distill_kl_ref(y_s, y_t, T)

    # 1) Default tile selection (single full-batch tile at these small shapes).
    loss0 = distill_kl(y_s, y_t, T)
    jax.block_until_ready(loss0)
    assert jnp.allclose(loss0, ref, rtol=1e-5, atol=1e-5), (loss0, ref)

    # 2) Forced multi-tile path (grid of 4, last tile only 2 valid rows).
    loss1 = distill_kl(y_s, y_t, T, block_rows=16)
    jax.block_until_ready(loss1)
    assert jnp.allclose(loss1, ref, rtol=1e-5, atol=1e-5), (loss1, ref)

    print("KERNEL_OK")
</pallas_src>

<mosaic_0001>
module attributes {stable_mosaic.version = 11 : i64} {
  func.func @_distill_kl_kernel(%arg0: i32, %arg1: memref<50x384xf32, #tpu.memory_space<vmem>>, %arg2: memref<50x384xf32, #tpu.memory_space<vmem>>, %arg3: memref<8x128xf32, #tpu.memory_space<vmem>>) attributes {dimension_semantics = [#tpu.dimension_semantics<parallel>], iteration_bounds = array<i64: 1>, scalar_prefetch = 0 : i64, scratch_operands = 0 : i64, tpu.core_type = #tpu.core_type<tc>, window_params = [{transform_indices = @transform_0, window_bounds = array<i64: 50, 384>}, {transform_indices = @transform_1, window_bounds = array<i64: 50, 384>}, {transform_indices = @transform_2, window_bounds = array<i64: 8, 128>}]} {
    %c0 = arith.constant 0 : index
    %c0_0 = arith.constant 0 : index
    %0 = vector.load %arg1[%c0, %c0_0] : memref<50x384xf32, #tpu.memory_space<vmem>>, vector<50x384xf32>
    %cst = arith.constant 2.500000e-01 : f32
    %1 = vector.broadcast %cst : f32 to vector<50x384xf32>
    %2 = arith.mulf %0, %1 : vector<50x384xf32>
    %c0_1 = arith.constant 0 : index
    %c0_2 = arith.constant 0 : index
    %3 = vector.load %arg2[%c0_1, %c0_2] : memref<50x384xf32, #tpu.memory_space<vmem>>, vector<50x384xf32>
    %cst_3 = arith.constant 2.500000e-01 : f32
    %4 = vector.broadcast %cst_3 : f32 to vector<50x384xf32>
    %5 = arith.mulf %3, %4 : vector<50x384xf32>
    %c50_i32 = arith.constant 50 : i32
    %6 = arith.muli %arg0, %c50_i32 : i32
    %7 = tpu.iota {dimensions = array<i32: 0>} : vector<50x1xi32>
    %8 = vector.broadcast %6 : i32 to vector<50x1xi32>
    %9 = arith.addi %8, %7 : vector<50x1xi32>
    %c50_i32_4 = arith.constant 50 : i32
    %10 = vector.broadcast %c50_i32_4 : i32 to vector<50x1xi32>
    %11 = arith.cmpi slt, %9, %10 : vector<50x1xi32>
    %cst_5 = arith.constant 0.000000e+00 : f32
    %12 = vector.shape_cast %11 : vector<50x1xi1> to vector<50x1xi1>
    %13 = vector.broadcast %12 : vector<50x1xi1> to vector<50x384xi1>
    %14 = vector.broadcast %cst_5 : f32 to vector<50x384xf32>
    %15 = arith.select %13, %2, %14 : vector<50x384xi1>, vector<50x384xf32>
    %cst_6 = arith.constant 0.000000e+00 : f32
    %16 = vector.shape_cast %11 : vector<50x1xi1> to vector<50x1xi1>
    %17 = vector.broadcast %16 : vector<50x1xi1> to vector<50x384xi1>
    %18 = vector.broadcast %cst_6 : f32 to vector<50x384xf32>
    %19 = arith.select %17, %5, %18 : vector<50x384xi1>, vector<50x384xf32>
    %cst_7 = arith.constant dense<0xFF800000> : vector<50xf32>
    %20 = vector.multi_reduction <maximumf>, %15, %cst_7 [1] : vector<50x384xf32> to vector<50xf32>
    %21 = vector.shape_cast %20 : vector<50xf32> to vector<50x1xf32>
    %22 = vector.broadcast %21 : vector<50x1xf32> to vector<50x384xf32>
    %23 = arith.subf %15, %22 : vector<50x384xf32>
    %24 = math.exp %23 : vector<50x384xf32>
    %cst_8 = arith.constant dense<0.000000e+00> : vector<50xf32>
    %25 = vector.multi_reduction <add>, %24, %cst_8 [1] : vector<50x384xf32> to vector<50xf32>
    %26 = vector.shape_cast %25 : vector<50xf32> to vector<50x1xf32>
    %27 = math.log %26 : vector<50x1xf32>
    %cst_9 = arith.constant dense<0xFF800000> : vector<50xf32>
    %28 = vector.multi_reduction <maximumf>, %19, %cst_9 [1] : vector<50x384xf32> to vector<50xf32>
    %29 = vector.shape_cast %28 : vector<50xf32> to vector<50x1xf32>
    %30 = vector.broadcast %29 : vector<50x1xf32> to vector<50x384xf32>
    %31 = arith.subf %19, %30 : vector<50x384xf32>
    %32 = math.exp %31 : vector<50x384xf32>
    %cst_10 = arith.constant dense<0.000000e+00> : vector<50xf32>
    %33 = vector.multi_reduction <add>, %32, %cst_10 [1] : vector<50x384xf32> to vector<50xf32>
    %34 = vector.shape_cast %33 : vector<50xf32> to vector<50x1xf32>
    %35 = math.log %34 : vector<50x1xf32>
    %36 = arith.subf %31, %23 : vector<50x384xf32>
    %37 = arith.mulf %32, %36 : vector<50x384xf32>
    %cst_11 = arith.constant dense<0.000000e+00> : vector<50xf32>
    %38 = vector.multi_reduction <add>, %37, %cst_11 [1] : vector<50x384xf32> to vector<50xf32>
    %39 = vector.shape_cast %38 : vector<50xf32> to vector<50x1xf32>
    %40 = arith.divf %39, %34 : vector<50x1xf32>
    %41 = arith.subf %27, %35 : vector<50x1xf32>
    %42 = arith.addf %40, %41 : vector<50x1xf32>
    %43 = arith.extui %11 : vector<50x1xi1> to vector<50x1xi32>
    %44 = arith.sitofp %43 : vector<50x1xi32> to vector<50x1xf32>
    %45 = arith.mulf %42, %44 : vector<50x1xf32>
    %46 = vector.shape_cast %45 : vector<50x1xf32> to vector<1x50x1xf32>
    %cst_12 = arith.constant dense<0.000000e+00> : vector<1xf32>
    %47 = vector.multi_reduction <add>, %46, %cst_12 [1, 2] : vector<1x50x1xf32> to vector<1xf32>
    %48 = vector.shape_cast %47 : vector<1xf32> to vector<1x1x1xf32>
    %49 = vector.extract %48[0, 0, 0] : f32 from vector<1x1x1xf32>
    %50 = tpu.iota {dimensions = array<i32: 0>} : vector<8x128xi32>
    %51 = tpu.iota {dimensions = array<i32: 1>} : vector<8x128xi32>
    %c0_i32 = arith.constant 0 : i32
    %52 = vector.broadcast %c0_i32 : i32 to vector<8x128xi32>
    %53 = arith.cmpi eq, %50, %52 : vector<8x128xi32>
    %c0_i32_13 = arith.constant 0 : i32
    %54 = vector.broadcast %c0_i32_13 : i32 to vector<8x128xi32>
    %55 = arith.cmpi eq, %51, %54 : vector<8x128xi32>
    %56 = arith.andi %53, %55 : vector<8x128xi1>
    %cst_14 = arith.constant 0.000000e+00 : f32
    %57 = vector.broadcast %49 : f32 to vector<8x128xf32>
    %58 = vector.broadcast %cst_14 : f32 to vector<8x128xf32>
    %59 = arith.select %56, %57, %58 : vector<8x128xi1>, vector<8x128xf32>
    %c0_15 = arith.constant 0 : index
    %c0_16 = arith.constant 0 : index
    %60 = vector.load %arg3[%c0_15, %c0_16] : memref<8x128xf32, #tpu.memory_space<vmem>>, vector<8x128xf32>
    tpu.vector_store %arg3[%c0_15, %c0_16], %59 {strides = array<i32>} : memref<8x128xf32, #tpu.memory_space<vmem>>, vector<8x128xf32>,
    return
  }
  func.func @transform_0(%arg0: i32) -> (i32, i32) {
    %c0_i32 = arith.constant 0 : i32
    %c0_i32_0 = arith.constant 0 : i32
    return %arg0, %c0_i32 : i32, i32
  }
  func.func @transform_1(%arg0: i32) -> (i32, i32) {
    %c0_i32 = arith.constant 0 : i32
    %c0_i32_0 = arith.constant 0 : i32
    return %arg0, %c0_i32 : i32, i32
  }
  func.func @transform_2(%arg0: i32) -> (i32, i32) {
    %c0_i32 = arith.constant 0 : i32
    %c0_i32_0 = arith.constant 0 : i32
    return %arg0, %c0_i32 : i32, i32
  }
}

</mosaic_0001>

<bundles_post_ra>
// kernel: tpu_custom_call.1
= control target key start
LH: loop header
LB: loop body
LE: loop exit
PB: predicated region body
PF: predicated region fallthrough
CT: control target
= control target key end

     0   :  { %7 = vsyncpa [#allocation3], 0  ;;  %s1677_s0 = inlined_call_operand.hbm [shape: f32[50,384], index: 0, kind: input, shape index: {}]   ;;  %s1678_s1 = inlined_call_operand.hbm [shape: f32[50,384], index: 1, kind: input, shape index: {}]   ;;  %s1679_s2 = inlined_call_operand.hbm [shape: f32[8,128], index: 2, kind: output, shape index: {}]  }
   0x1   :  { %8 = vsyncpa [#allocation6], 0 }
   0x2   :  { %9 = vsyncpa [#allocation4], 0  ;;  %s14_s11 = sshll.u32 %s1677_s0, 4  ;;  %s956_s12 = smov [#allocation2]   ;;  %s15_s11 = int_to_ptr.hbm [resolvable:$true] %s14_s11 }
   0x3   :  { %s16_s13 = sshll.u32 %s956_s12, 4  ;;  %s27_s16 = sshll.u32 %s1678_s1, 4  ;;  %s17_s13 = int_to_ptr.vmem [resolvable:$true] %s16_s13  ;;  %s28_s16 = int_to_ptr.hbm [resolvable:$true] %s27_s16 }
   0x4   :  { %s957_s17 = smov 384   ;;  %s958_s18 = smov 24  }
   0x5   :  { %22 = dma.hbm_to_vmem [thread:$0]  %s15_s11, 2688, %s17_s13, [#allocation3], %s957_s17, %s957_s17, %s958_s18  }
   0x6   :  { %s959_s19 = smov [#allocation5]  }
   0x7   :  { %s29_s20 = sshll.u32 %s959_s19, 4  ;;  %s30_s20 = int_to_ptr.vmem [resolvable:$true] %s29_s20 }
   0x8   :  { %35 = dma.hbm_to_vmem [thread:$0]  %s28_s16, 2688, %s30_s20, [#allocation6], %s957_s17, %s957_s17, %s958_s18  }
   0x9   :  { %950 = dma.done.wait [#allocation3], 2688  }
   0xa   :  { %951 = vsyncadd [#allocation3], 4294964608 }
   0xb   :  { %952 = dma.done.wait [#allocation6], 2688  }
   0xc   :  { %953 = vsyncadd [#allocation6], 4294964608  ;;  %v1680_v0 = vlaneseq  ;;  %v98_v3 = vld [vmem:[#allocation5 + $0x60] sm:$0xff]  ;;  %v99_v4 = vld [vmem:[#allocation5 + $0x68] sm:$0xff]  ;;  %vm232_vm1 = vcmask 1041408   ;;  %s961_s0 = smov [#allocation7]  }
   0xd   :  { %v100_v5 = vld [vmem:[#allocation5 + $0x70] sm:$0xff]  ;;  %v990_v6 = vmul.f32 0.25, %v98_v3  ;;  %v992_v7 = vmul.f32 0.25, %v99_v4  ;;  %v93_v10 = vld [vmem:[#allocation5 + $0x38] sm:$0xff]  ;;  %v94_v11 = vld [vmem:[#allocation5 + $0x40] sm:$0xff]  ;;  %s730_s1 = sshll.u32 %s961_s0, 4  ;;  %s731_s1 = int_to_ptr.vmem [resolvable:$true] %s730_s1 }
   0xe   :  { %v984_v1 = vshrl.u32 %v1680_v0, 7  ;;  %v994_v8 = vmul.f32 0.25, %v100_v5  ;;  %v92_v9 = vld [vmem:[#allocation5 + $0x30] sm:$0xff]  ;;  %v998_v13 = vmul.f32 0.25, %v93_v10  ;;  %v1000_v14 = vmul.f32 0.25, %v94_v11  ;;  %v86_v15 = vld [vmem:[#allocation5] sm:$0xff] }
   0xf   :  { %v996_v12 = vmul.f32 0.25, %v92_v9  ;;  %v87_v16 = vld [vmem:[#allocation5 + $0x8] sm:$0xff]  ;;  %v88_v17 = vld [vmem:[#allocation5 + $0x10] sm:$0xff]  ;;  %v364_v18 = vmax.f32 %v990_v6, %v992_v7  ;;  %v1004_v19 = vmul.f32 0.25, %v86_v15  ;;  %v101_v22 = vld [vmem:[#allocation5 + $0x78] sm:$0xff]  ;;  %s732_s23 = sshll.u32 %s1679_s2, 4  ;;  %s733_s23 = int_to_ptr.hbm [resolvable:$true] %s732_s23 }
  0x10   :  { %1701 = vst [vmem:[#allocation11_spill] sm:$0xff] %v984_v1  ;;  %v987_v2 = vadd.s32 48, %v984_v1  ;;  %v1006_v20 = vmul.f32 0.25, %v87_v16  ;;  %v1008_v21 = vmul.f32 0.25, %v88_v17  ;;  %v102_v23 = vld [vmem:[#allocation5 + $0x80] sm:$0xff]  ;;  %v103_v24 = vld [vmem:[#allocation5 + $0x88] sm:$0xff] }
  0x11   :  { %v356_v25 = vmax.f32 %v996_v12, %v998_v13  ;;  %v1012_v26 = vmul.f32 0.25, %v101_v22  ;;  %v1014_v27 = vmul.f32 0.25, %v102_v23  ;;  %v1016_v28 = vmul.f32 0.25, %v103_v24  ;;  %v95_v29 = vld [vmem:[#allocation5 + $0x48] sm:$0xff]  ;;  %v96_v30 = vld [vmem:[#allocation5 + $0x50] sm:$0xff]  ;;  %v97_v31 = vld [vmem:[#allocation5 + $0x58] sm:$0xff] }
  0x12   :  { %1702 = vst [vmem:[#allocation12_spill] sm:$0xff] %v987_v2  ;;  %vm151_vm0 = vcmp.lt.s32.totalorder %v987_v2, 50  ;;  %v365_v32 = vmax.f32 %v364_v18, %v994_v8  ;;  %v348_v33 = vmax.f32 %v1004_v19, %v1006_v20  ;;  %v1021_v34 = vmul.f32 0.25, %v95_v29  ;;  %v89_v36 = vld [vmem:[#allocation5 + $0x18] sm:$0xff]  ;;  %v90_v37 = vld [vmem:[#allocation5 + $0x20] sm:$0xff]  ;;  %v91_v40 = vld [vmem:[#allocation5 + $0x28] sm:$0xff] }
  0x13   :  { %v1023_v35 = vmul.f32 0.25, %v96_v30  ;;  %v357_v38 = vmax.f32 %v356_v25, %v1000_v14  ;;  %v368_v39 = vmax.f32 %v1012_v26, %v1014_v27  ;;  %v1028_v41 = vmul.f32 0.25, %v89_v36  ;;  %v104_v42 = vld [vmem:[#allocation5 + $0x90] sm:$0x3]  ;;  %v105_v43 = vld [vmem:[#allocation5 + $0x98] sm:$0x3] }
  0x14   :  { %366 = vmax.xlane.f32.xlu2 %v365_v32  ;;  %v349_v44 = vmax.f32 %v348_v33, %v1008_v21  ;;  %v1031_v45 = vmul.f32 0.25, %v97_v31  ;;  %v1035_v47 = vmul.f32 0.25, %v90_v37  ;;  %v106_v48 = vld [vmem:[#allocation5 + $0xa0] sm:$0x3]  ;;  %v125_v49 = vmul.f32 0.25, %v104_v42  ;;  %v47_v54 = vld [vmem:[#allocation2 + $0x18] sm:$0xff] }
  0x15   :  { %v360_v46 = vmax.f32 %v1021_v34, %v1023_v35  ;;  %358 = vmax.xlane.f32.xlu1 %v357_v38  ;;  %v126_v50 = vmul.f32 0.25, %v105_v43  ;;  %v1037_v51 = vmul.f32 0.25, %v91_v40  ;;  %v127_v53 = vmul.f32 0.25, %v106_v48  ;;  %v48_v55 = vld [vmem:[#allocation2 + $0x20] sm:$0xff]  ;;  %v45_v59 = vld [vmem:[#allocation2 + $0x8] sm:$0xff]  ;;  %v46_v16 = vld [vmem:[#allocation2 + $0x10] sm:$0xff] }
  0x16   :  { %350 = vmax.xlane.f32.xlu0 %v349_v44  ;;  %v352_v52 = vmax.f32 %v1028_v41, %v1035_v47  ;;  %v1043_v56 = vsel %vm151_vm0, %v125_v49, 0.0  ;;  %v44_v58 = vld [vmem:[#allocation2] sm:$0xff]  ;;  %v369_v60 = vmax.f32 %v368_v39, %v1016_v28  ;;  %v1055_v3 = vmul.f32 0.25, %v47_v54  ;;  %v49_v10 = vld [vmem:[#allocation2 + $0x28] sm:$0xff]  ;;  %v54_v32 = vld [vmem:[#allocation2 + $0x50] sm:$0xff] }
  0x17   :  { %v1047_v57 = vsel %vm151_vm0, %v126_v50, 0.0  ;;  %v361_v61 = vmax.f32 %v360_v46, %v1031_v45  ;;  %v372_v62 = vsel %vm232_vm1, %v1043_v56, -inf  ;;  %v1057_v4 = vmul.f32 0.25, %v48_v55  ;;  %v56_v24 = vld [vmem:[#allocation2 + $0x60] sm:$0xff]  ;;  %v57_v25 = vld [vmem:[#allocation2 + $0x68] sm:$0xff]  ;;  %v50_v33 = vld [vmem:[#allocation2 + $0x30] sm:$0xff] }
  0x18   :  { %v373_v63 = vsel %vm232_vm1, %v1047_v57, -inf  ;;  %v353_v5 = vmax.f32 %v352_v52, %v1037_v51  ;;  %v1062_v9 = vsel %vm151_vm0, %v127_v53, 0.0  ;;  %v1064_v11 = vmul.f32 0.25, %v44_v58  ;;  %v53_v31 = vld [vmem:[#allocation2 + $0x48] sm:$0xff]  ;;  %v51_v36 = vld [vmem:[#allocation2 + $0x38] sm:$0xff]  ;;  %v58_v38 = vld [vmem:[#allocation2 + $0x70] sm:$0xff] }
  0x19   :  { %v1066_v15 = vmul.f32 0.25, %v45_v59  ;;  %v374_v17 = vmax.f32 %v372_v62, %v373_v63  ;;  %v375_v18 = vsel %vm232_vm1, %v1062_v9, -inf  ;;  %v1070_v22 = vmul.f32 0.25, %v49_v10  ;;  %v62_v46 = vld [vmem:[#allocation2 + $0x90] sm:$0x3]  ;;  %v55_v50 = vld [vmem:[#allocation2 + $0x58] sm:$0xff] }
  0x1a   :  { %v212_v23 = vmax.f32 %v1055_v3, %v1057_v4  ;;  %v1074_v29 = vmul.f32 0.25, %v46_v16  ;;  %v1078_v39 = vmul.f32 0.25, %v56_v24  ;;  %v1080_v40 = vmul.f32 0.25, %v57_v25  ;;  %v63_v48 = vld [vmem:[#allocation2 + $0x98] sm:$0x3]  ;;  %v52_v54 = vld [vmem:[#allocation2 + $0x40] sm:$0xff] }
  0x1b   :  { %v208_v30 = vmax.f32 %v1064_v11, %v1066_v15  ;;  %v376_v37 = vmax.f32 %v374_v17, %v375_v18  ;;  %v1083_v43 = vmul.f32 0.25, %v53_v31  ;;  %v1085_v44 = vmul.f32 0.25, %v54_v32  ;;  %v64_v63 = vld [vmem:[#allocation2 + $0xa0] sm:$0x3]  ;;  %v59_v16 = vld [vmem:[#allocation2 + $0x78] sm:$0xff] }
  0x1c   :  { %370 = vmax.xlane.f32.xlu2 %v369_v60  ;;  %v213_v42 = vmax.f32 %v212_v23, %v1070_v22  ;;  %v1088_v52 = vmul.f32 0.25, %v50_v33  ;;  %v1090_v53 = vmul.f32 0.25, %v51_v36  ;;  %v1092_v55 = vmul.f32 0.25, %v58_v38  ;;  %v60_v17 = vld [vmem:[#allocation2 + $0x80] sm:$0xff]  ;;  %v61_v36 = vld [vmem:[#allocation2 + $0x88] sm:$0xff] }
  0x1d   :  { %362 = vmax.xlane.f32.xlu1 %v361_v61  ;;  %v209_v49 = vmax.f32 %v208_v30, %v1074_v29  ;;  %v224_v58 = vmax.f32 %v1078_v39, %v1080_v40  ;;  %v83_v59 = vmul.f32 0.25, %v62_v46  ;;  %v84_v60 = vmul.f32 0.25, %v63_v48 }
  0x1e   :  { %354 = vmax.xlane.f32.xlu0 %v353_v5  ;;  %v1096_v61 = vmul.f32 0.25, %v55_v50  ;;  %v220_v62 = vmax.f32 %v1083_v43, %v1085_v44  ;;  %v1100_v5 = vmul.f32 0.25, %v52_v54  ;;  %v216_v10 = vmax.f32 %v1088_v52, %v1090_v53 }
  0x1f   :  { %v225_v18 = vmax.f32 %v224_v58, %v1092_v55  ;;  %v85_v23 = vmul.f32 0.25, %v64_v63  ;;  %v1107_v24 = vsel %vm151_vm0, %v83_v59, 0.0  ;;  %v1111_v25 = vsel %vm151_vm0, %v84_v60, 0.0 }
  0x20   :  { %v221_v30 = vmax.f32 %v220_v62, %v1096_v61  ;;  %v1114_v31 = vmul.f32 0.25, %v59_v16  ;;  %v1116_v32 = vmul.f32 0.25, %v60_v17  ;;  %v217_v33 = vmax.f32 %v216_v10, %v1100_v5 }
  0x21   :  { %v234_v38 = vsel %vm232_vm1, %v1111_v25, -inf  ;;  %v1127_v46 = vmul.f32 0.25, %v61_v36 }
  0x22   :  { %v228_v48 = vmax.f32 %v1114_v31, %v1116_v32 }
  0x24   :  { %377 = vmax.xlane.f32.xlu2 %v376_v37  ;;  %v233_v37 = vsel %vm232_vm1, %v1107_v24, -inf  ;;  %v229_v54 = vmax.f32 %v228_v48, %v1127_v46 }
  0x25   :  { %214 = vmax.xlane.f32.xlu1 %v213_v42  ;;  %v1125_v42 = vsel %vm151_vm0, %v85_v23, 0.0 }
  0x26   :  { %210 = vmax.xlane.f32.xlu0 %v209_v49  ;;  %v235_v49 = vmax.f32 %v233_v37, %v234_v38  ;;  %v236_v50 = vsel %vm232_vm1, %v1125_v42, -inf }
  0x28   :  { %v237_v58 = vmax.f32 %v235_v49, %v236_v50 }
  0x2c   :  { %226 = vmax.xlane.f32.xlu2 %v225_v18 }
  0x2d   :  { %222 = vmax.xlane.f32.xlu1 %v221_v30 }
  0x2e   :  { %218 = vmax.xlane.f32.xlu0 %v217_v33 }
  0x35   :  { %230 = vmax.xlane.f32.xlu1 %v229_v54 }
  0x36   :  { %238 = vmax.xlane.f32.xlu0 %v237_v58 }
  0x87   :  { %v367_v59 = vpop.xlane.xlu2 %366 }
  0x88   :  { %v359_v60 = vpop.xlane.xlu1 %358  ;;  %v1151_v30 = vsub.f32 %v990_v6, %v367_v59  ;;  %v1163_v36 = vsub.f32 %v994_v8, %v367_v59 }
  0x89   :  { %v1135_v62 = vsub.f32 %v996_v12, %v359_v60  ;;  %v1138_v63 = vsub.f32 %v998_v13, %v359_v60  ;;  %v1141_v10 = vsub.f32 %v1000_v14, %v359_v60  ;;  %v351_v16 = vpop.xlane.xlu0 %350  ;;  %v1155_v13 = vsub.f32 %v992_v7, %v367_v59 }
  0x8a   :  { %v1144_v17 = vsub.f32 %v1004_v19, %v351_v16  ;;  %v1148_v23 = vsub.f32 %v1006_v20, %v351_v16  ;;  %v1159_v33 = vsub.f32 %v1008_v21, %v351_v16  ;;  %1704 = vst [vmem:[#allocation14_spill] sm:$0xff] %v1163_v36  ;;  %v424_v37 = vmul.f32 1.442695, %v1151_v30 }
  0x8b   :  { %1703 = vst [vmem:[#allocation13_spill] sm:$0xff] %v1141_v10  ;;  %v412_v18 = vmul.f32 1.442695, %v1135_v62  ;;  %v414_v12 = vmul.f32 1.442695, %v1138_v63 }
  0x8c   :  { %v416_v14 = vmul.f32 1.442695, %v1141_v10  ;;  %v400_v19 = vmul.f32 1.442695, %v1144_v17  ;;  %v402_v20 = vmul.f32 1.442695, %v1148_v23 }
  0x8d   :  { %752 = vpow2.f32 %v412_v18  ;;  %v426_v7 = vmul.f32 1.442695, %v1155_v13  ;;  %v404_v8 = vmul.f32 1.442695, %v1159_v33  ;;  %v428_v54 = vmul.f32 1.442695, %v1163_v36 }
  0x8e   :  { %754 = vpow2.f32 %v414_v12 }
  0x8f   :  { %v371_v6 = vpop.xlane.xlu2 %370  ;;  %756 = vpow2.f32 %v416_v14 }
  0x90   :  { %v363_v38 = vpop.xlane.xlu1 %362  ;;  %758 = vpow2.f32 %v400_v19  ;;  %v1180_v58 = vsub.f32 %v1012_v26, %v371_v6  ;;  %v1195_v26 = vsub.f32 %v1014_v27, %v371_v6 }
  0x91   :  { %v1169_v48 = vsub.f32 %v1021_v34, %v363_v38  ;;  %v1172_v21 = vsub.f32 %v1023_v35, %v363_v38  ;;  %v355_v49 = vpop.xlane.xlu0 %354  ;;  %v1176_v50 = vsub.f32 %v1031_v45, %v363_v38  ;;  %760 = vpow2.f32 %v402_v20 }
  0x92   :  { %1706 = vst [vmem:[#allocation16_spill] sm:$0xff] %v1180_v58  ;;  %762 = vpow2.f32 %v424_v37  ;;  %v1184_v59 = vsub.f32 %v1028_v41, %v355_v49  ;;  %v1190_v45 = vsub.f32 %v1035_v47, %v355_v49  ;;  %v1201_v41 = vsub.f32 %v1016_v28, %v371_v6 }
  0x93   :  { %1705 = vst [vmem:[#allocation15_spill] sm:$0xff] %v1176_v50  ;;  %v418_v34 = vmul.f32 1.442695, %v1169_v48  ;;  %v1186_v35 = vpop.eup %752  ;;  %764 = vpow2.f32 %v426_v7  ;;  %v420_v60 = vmul.f32 1.442695, %v1172_v21  ;;  %v1209_v27 = vsub.f32 %v1037_v51, %v355_v49 }
  0x94   :  { %1707 = vst [vmem:[#allocation17_spill] sm:$0xff] %v1186_v35  ;;  %v1192_v16 = vpop.eup %754  ;;  %766 = vpow2.f32 %v404_v8  ;;  %v422_v18 = vmul.f32 1.442695, %v1176_v50  ;;  %v430_v14 = vmul.f32 1.442695, %v1180_v58 }
  0x95   :  { %1708 = vst [vmem:[#allocation18_spill] sm:$0xff] %v1192_v16  ;;  %v1198_v12 = vpop.eup %756  ;;  %768 = vpow2.f32 %v428_v54  ;;  %v450_v47 = vadd.f32 %v1192_v16, %v1186_v35  ;;  %v406_v37 = vmul.f32 1.442695, %v1184_v59  ;;  %v408_v28 = vmul.f32 1.442695, %v1190_v45 }
  0x96   :  { %1709 = vst [vmem:[#allocation19_spill] sm:$0xff] %v1195_v26  ;;  %v1206_v20 = vpop.eup %758  ;;  %770 = vpow2.f32 %v418_v34  ;;  %v432_v34 = vmul.f32 1.442695, %v1195_v26  ;;  %v410_v1 = vmul.f32 1.442695, %v1209_v27 }
  0x97   :  { %1710 = vst [vmem:[#allocation20_spill] sm:$0xff] %v1198_v12  ;;  %v378_v19 = vpop.xlane.xlu2 %377  ;;  %v1212_v7 = vpop.eup %760  ;;  %772 = vpow2.f32 %v420_v60  ;;  %v451_v6 = vadd.f32 %v1198_v12, %v450_v47  ;;  %v434_v60 = vmul.f32 1.442695, %v1201_v41 }
  0x98   :  { %1711 = vst [vmem:[#allocation21_spill] sm:$0xff] %v1201_v41  ;;  %v215_v38 = vpop.xlane.xlu1 %214  ;;  %v1219_v54 = vpop.eup %762  ;;  %774 = vpow2.f32 %v422_v18  ;;  %v442_v47 = vadd.f32 %v1212_v7, %v1206_v20 }
  0x99   :  { %v1217_v8 = vsub.f32 %v1055_v3, %v215_v38  ;;  %v1223_v51 = vsub.f32 %v1057_v4, %v215_v38  ;;  %v211_v49 = vpop.xlane.xlu0 %210  ;;  %v1225_v0 = vpop.eup %764  ;;  %776 = vpow2.f32 %v430_v14  ;;  %452 = vadd.xlane.f32.xlu1 %v451_v6  ;;  %v1234_v18 = vsub.f32 %v1070_v22, %v215_v38 }
  0x9a   :  { %v1230_v3 = vpop.eup %766  ;;  %778 = vpow2.f32 %v406_v37  ;;  %v1241_v41 = vsub.f32 %v1064_v11, %v211_v49  ;;  %v1247_v6 = vsub.f32 %v1066_v15, %v211_v49  ;;  %v1250_v22 = vsub.f32 %v1074_v29, %v211_v49 }
  0x9b   :  { %v1236_v4 = vpop.eup %768  ;;  %780 = vpow2.f32 %v408_v28  ;;  %v443_v2 = vadd.f32 %v1230_v3, %v442_v47  ;;  %v267_v14 = vmul.f32 1.442695, %v1217_v8  ;;  %v269_v37 = vmul.f32 1.442695, %v1223_v51 }
  0x9c   :  { %v1243_v12 = vpop.eup %770  ;;  %782 = vpow2.f32 %v432_v34  ;;  %v271_v28 = vmul.f32 1.442695, %v1234_v18  ;;  %v1258_v34 = vsub.f32 %v1043_v56, %v378_v19  ;;  %v261_v26 = vmul.f32 1.442695, %v1241_v41 }
  0x9d   :  { %1712 = vst [vmem:[#allocation22_spill] sm:$0xff] %v1243_v12  ;;  %v1252_v38 = vpop.eup %772  ;;  %784 = vpow2.f32 %v434_v60  ;;  %444 = vadd.xlane.f32.xlu2 %v443_v2  ;;  %v263_v15 = vmul.f32 1.442695, %v1247_v6  ;;  %v1277_v60 = vsub.f32 %v1047_v57, %v378_v19  ;;  %v265_v10 = vmul.f32 1.442695, %v1250_v22 }
  0x9e   :  { %1713 = vst [vmem:[#allocation23_spill] sm:$0xff] %v1252_v38  ;;  %v1255_v11 = vpop.eup %774  ;;  %786 = vpow2.f32 %v410_v1  ;;  %v454_v2 = vadd.f32 %v1252_v38, %v1243_v12  ;;  %v436_v38 = vmul.f32 1.442695, %v1258_v34 }
  0x9f   :  { %v227_v47 = vpop.xlane.xlu2 %226  ;;  %1714 = vst [vmem:[#allocation24_spill] sm:$0xff] %v1255_v11  ;;  %v1264_v29 = vpop.eup %776  ;;  %788 = vpow2.f32 %v267_v14  ;;  %v1283_v14 = vsub.f32 %v1062_v9, %v378_v19  ;;  %v438_v19 = vmul.f32 1.442695, %v1277_v60 }
  0xa0   :  { %1715 = vst [vmem:[#allocation25_spill] sm:$0xff] %v1258_v34  ;;  %v1262_v58 = vpop.xlane.xlu1 %222  ;;  %v1269_v49 = vsub.f32 %v1078_v39, %v227_v47  ;;  %v1272_v1 = vsub.f32 %v1080_v40, %v227_v47  ;;  %v1274_v56 = vpop.eup %778  ;;  %790 = vpow2.f32 %v269_v37  ;;  %v455_v39 = vadd.f32 %v1255_v11, %v454_v2 }
  0xa1   :  { %1716 = vst [vmem:[#allocation26_spill] sm:$0xff] %v1277_v60  ;;  %v1280_v36 = vpop.eup %780  ;;  %792 = vpow2.f32 %v271_v28  ;;  %v1290_v35 = vsub.f32 %v1092_v55, %v227_v47  ;;  %v219_v37 = vpop.xlane.xlu0 %218  ;;  %v440_v55 = vmul.f32 1.442695, %v1283_v14 }
  0xa2   :  { %1717 = vst [vmem:[#allocation27_spill] sm:$0xff] %v1283_v14  ;;  %v285_v16 = vmul.f32 1.442695, %v1269_v49  ;;  %v1287_v40 = vpop.eup %782  ;;  %794 = vpow2.f32 %v261_v26  ;;  %v287_v57 = vmul.f32 1.442695, %v1272_v1  ;;  %v446_v28 = vadd.f32 %v1280_v36, %v1274_v56 }
  0xa3   :  { %1718 = vst [vmem:[#allocation28_spill] sm:$0xff] %v1290_v35  ;;  %v1293_v50 = vpop.eup %784  ;;  %796 = vpow2.f32 %v263_v15  ;;  %v1303_v47 = vsub.f32 %v1088_v52, %v219_v37  ;;  %v1306_v2 = vsub.f32 %v1090_v53, %v219_v37  ;;  %v289_v11 = vmul.f32 1.442695, %v1290_v35 }
  0xa4   :  { %v1296_v9 = vpop.eup %786  ;;  %798 = vpow2.f32 %v265_v10  ;;  %v1311_v34 = vsub.f32 %v1100_v5, %v219_v37 }
  0xa5   :  { %v789_v26 = vpop.eup %788  ;;  %456 = vadd.xlane.f32.xlu2 %v455_v39  ;;  %800 = vpow2.f32 %v285_v16  ;;  %v447_v10 = vadd.f32 %v1296_v9, %v446_v28  ;;  %v273_v16 = vmul.f32 1.442695, %v1303_v47  ;;  %v275_v52 = vmul.f32 1.442695, %v1306_v2 }
  0xa6   :  { %v791_v15 = vpop.eup %790  ;;  %802 = vpow2.f32 %v287_v57  ;;  %1719 = vst [vmem:[#allocation29_spill] sm:$0xff] %v1311_v34  ;;  %v458_v57 = vadd.f32 %v1225_v0, %v1219_v54  ;;  %v277_v28 = vmul.f32 1.442695, %v1311_v34 }
  0xa7   :  { %v793_v12 = vpop.eup %792  ;;  %804 = vpow2.f32 %v436_v38  ;;  %448 = vadd.xlane.f32.xlu0 %v447_v10  ;;  %v307_v53 = vadd.f32 %v791_v15, %v789_v26 }
  0xa8   :  { %v231_v60 = vpop.xlane.xlu1 %230  ;;  %v795_v39 = vpop.eup %794  ;;  %806 = vpow2.f32 %v438_v19  ;;  %v1326_v19 = vsub.f32 %v1083_v43, %v1262_v58 }
  0xa9   :  { %v797_v14 = vpop.eup %796  ;;  %808 = vpow2.f32 %v440_v55  ;;  %v1319_v38 = vsub.f32 %v1114_v31, %v231_v60  ;;  %v1322_v5 = vsub.f32 %v1116_v32, %v231_v60  ;;  %v308_v26 = vadd.f32 %v793_v12, %v307_v53  ;;  %v239_v12 = vpop.xlane.xlu0 %238 }
  0xaa   :  { %v799_v37 = vpop.eup %798  ;;  %810 = vpow2.f32 %v289_v11  ;;  %v303_v15 = vadd.f32 %v797_v14, %v795_v39  ;;  %v1330_v55 = vsub.f32 %v1085_v44, %v1262_v58  ;;  %v279_v35 = vmul.f32 1.442695, %v1326_v19 }
  0xab   :  { %v801_v10 = vpop.eup %800  ;;  %812 = vpow2.f32 %v273_v16  ;;  %v291_v31 = vmul.f32 1.442695, %v1319_v38  ;;  %v293_v34 = vmul.f32 1.442695, %v1322_v5  ;;  %v1336_v11 = vsub.f32 %v1127_v46, %v231_v60 }
  0xac   :  { %v803_v32 = vpop.eup %802  ;;  %814 = vpow2.f32 %v275_v52  ;;  %v304_v43 = vadd.f32 %v799_v37, %v303_v15  ;;  %v281_v39 = vmul.f32 1.442695, %v1330_v55  ;;  %v459_v44 = vadd.f32 %v1236_v4, %v458_v57 }
  0xad   :  { %1720 = vst [vmem:[#allocation30_spill] sm:$0xff] %v1336_v11  ;;  %v1338_v14 = vpop.eup %804  ;;  %816 = vpow2.f32 %v277_v28  ;;  %309 = vadd.xlane.f32.xlu2 %v308_v26  ;;  %v1346_v53 = vsub.f32 %v1096_v61, %v1262_v58  ;;  %v295_v46 = vmul.f32 1.442695, %v1336_v11  ;;  %v319_v60 = vadd.f32 %v803_v32, %v801_v10 }
  0xae   :  { %v1342_v16 = vpop.eup %806  ;;  %818 = vpow2.f32 %v291_v31  ;;  %305 = vadd.xlane.f32.xlu1 %v304_v43  ;;  %v1352_v37 = vsub.f32 %v1107_v24, %v239_v12  ;;  %v1356_v26 = vsub.f32 %v1111_v25, %v239_v12  ;;  %v462_v24 = vadd.f32 %v1287_v40, %v1264_v29 }
  0xaf   :  { %v1349_v52 = vpop.eup %808  ;;  %820 = vpow2.f32 %v293_v34  ;;  %v283_v57 = vmul.f32 1.442695, %v1346_v53  ;;  %460 = vadd.xlane.f32.xlu0 %v459_v44  ;;  %v1363_v43 = vsub.f32 %v1125_v42, %v239_v12  ;;  %v466_v44 = vsel %vm232_vm1, %v1338_v14, 0.0 }
  0xb0   :  { %v811_v28 = vpop.eup %810  ;;  %822 = vpow2.f32 %v279_v35  ;;  %v297_v58 = vmul.f32 1.442695, %v1352_v37  ;;  %v299_v10 = vmul.f32 1.442695, %v1356_v26 }
  0xb1   :  { %v813_v61 = vpop.eup %812  ;;  %824 = vpow2.f32 %v281_v39  ;;  %v320_v34 = vadd.f32 %v811_v28, %v319_v60  ;;  %v301_v60 = vmul.f32 1.442695, %v1363_v43  ;;  %v463_v28 = vadd.f32 %v1293_v50, %v462_v24 }
  0xb2   :  { %v815_v15 = vpop.eup %814  ;;  %826 = vpow2.f32 %v295_v46  ;;  %v467_v46 = vsel %vm232_vm1, %v1342_v16, 0.0 }
  0xb3   :  { %v817_v31 = vpop.eup %816  ;;  %v311_v35 = vadd.f32 %v815_v15, %v813_v61  ;;  %828 = vpow2.f32 %v283_v57  ;;  %v487_v61 = vsub.f32 %v1144_v17, %v1241_v41  ;;  %v468_v15 = vadd.f32 %v467_v46, %v466_v44 }
  0xb4   :  { %v819_v32 = vpop.eup %818  ;;  %830 = vpow2.f32 %v297_v58  ;;  %v488_v58 = vsub.f32 %v1148_v23, %v1247_v6  ;;  %v494_v46 = vsub.f32 %v1138_v63, %v1306_v2  ;;  %v1725_v2 = vld [vmem:[#allocation15_spill] sm:$0xff] }
  0xb5   :  { %v821_v25 = vpop.eup %820  ;;  %v312_v39 = vadd.f32 %v817_v31, %v311_v35  ;;  %832 = vpow2.f32 %v299_v10  ;;  %v490_v10 = vsub.f32 %v1184_v59, %v1217_v8  ;;  %v491_v31 = vsub.f32 %v1190_v45, %v1223_v51 }
  0xb6   :  { %v823_v11 = vpop.eup %822  ;;  %321 = vadd.xlane.f32.xlu1 %v320_v34  ;;  %v323_v42 = vadd.f32 %v821_v25, %v819_v32  ;;  %834 = vpow2.f32 %v301_v60  ;;  %v469_v32 = vsel %vm232_vm1, %v1349_v52, 0.0  ;;  %v508_v23 = vmul.f32 %v1206_v20, %v487_v61  ;;  %v1721_v60 = vld [vmem:[#allocation25_spill] sm:$0xff] }
  0xb7   :  { %v825_v57 = vpop.eup %824  ;;  %313 = vadd.xlane.f32.xlu2 %v312_v39  ;;  %464 = vadd.xlane.f32.xlu0 %v463_v28  ;;  %v470_v41 = vadd.f32 %v469_v32, %v468_v15  ;;  %v509_v6 = vmul.f32 %v1212_v7, %v488_v58  ;;  %v511_v39 = vmul.f32 %v1274_v56, %v490_v10  ;;  %v1722_v28 = vld [vmem:[#allocation22_spill] sm:$0xff]  ;;  %v1726_v61 = vld [vmem:[#allocation17_spill] sm:$0xff]  ;;  %v1728_v10 = vld [vmem:[#allocation28_spill] sm:$0xff] }
  0xb8   :  { %v827_v12 = vpop.eup %826  ;;  %v315_v34 = vadd.f32 %v825_v57, %v823_v11  ;;  %v512_v59 = vmul.f32 %v1280_v36, %v491_v31  ;;  %v489_v45 = vsub.f32 %v1159_v33, %v1250_v22  ;;  %v492_v51 = vsub.f32 %v1209_v27, %v1234_v18  ;;  %v1727_v58 = vld [vmem:[#allocation18_spill] sm:$0xff] }
  0xb9   :  { %v829_v24 = vpop.eup %828  ;;  %v324_v25 = vadd.f32 %v827_v12, %v323_v42  ;;  %v496_v7 = vsub.f32 %v1169_v48, %v1326_v19  ;;  %v497_v36 = vsub.f32 %v1172_v21, %v1330_v55  ;;  %v529_v56 = vadd.f32 %v509_v6, %v508_v23  ;;  %v1729_v31 = vld [vmem:[#allocation14_spill] sm:$0xff]  ;;  %v1734_v6 = vld [vmem:[#allocation24_spill] sm:$0xff] }
  0xba   :  { %v831_v35 = vpop.eup %830  ;;  %v316_v8 = vadd.f32 %v829_v24, %v315_v34  ;;  %v499_v33 = vsub.f32 %v1151_v30, %v1269_v49  ;;  %v500_v22 = vsub.f32 %v1155_v13, %v1272_v1  ;;  %v533_v27 = vadd.f32 %v512_v59, %v511_v39  ;;  %v1723_v1 = vld [vmem:[#allocation23_spill] sm:$0xff]  ;;  %v1730_v34 = vld [vmem:[#allocation29_spill] sm:$0xff] }
  0xbb   :  { %v833_v17 = vpop.eup %832  ;;  %v327_v11 = vsel %vm232_vm1, %v831_v35, 0.0  ;;  %v493_v18 = vsub.f32 %v1135_v62, %v1303_v47  ;;  %v510_v48 = vmul.f32 %v1230_v3, %v489_v45  ;;  %v513_v21 = vmul.f32 %v1296_v9, %v492_v51  ;;  %v1724_v62 = vld [vmem:[#allocation26_spill] sm:$0xff]  ;;  %v1731_v35 = vld [vmem:[#allocation13_spill] sm:$0xff] }
  0xbc   :  { %v328_v44 = vsel %vm232_vm1, %v833_v17, 0.0  ;;  %v835_v20 = vpop.eup %834  ;;  %v505_v30 = vsub.f32 %v1721_v60, %v1352_v37  ;;  %v517_v13 = vmul.f32 %v1722_v28, %v496_v7  ;;  %v518_v57 = vmul.f32 %v1723_v1, %v497_v36 }
  0xbd   :  { %v329_v19 = vadd.f32 %v328_v44, %v327_v11  ;;  %v330_v55 = vsel %vm232_vm1, %v835_v20, 0.0  ;;  %v530_v49 = vadd.f32 %v529_v56, %v510_v48  ;;  %v506_v47 = vsub.f32 %v1724_v62, %v1356_v26  ;;  %v1736_v44 = vld [vmem:[#allocation20_spill] sm:$0xff] }
  0xbe   :  { %471 = vadd.xlane.f32.xlu1 %v470_v41  ;;  %v534_v42 = vadd.f32 %v533_v27, %v513_v21  ;;  %v520_v63 = vmul.f32 %v1219_v54, %v499_v33  ;;  %v521_v3 = vmul.f32 %v1225_v0, %v500_v22  ;;  %v498_v12 = vsub.f32 %v1725_v2, %v1346_v53  ;;  %v1732_v53 = vld [vmem:[#allocation16_spill] sm:$0xff]  ;;  %v1733_v41 = vld [vmem:[#allocation19_spill] sm:$0xff]  ;;  %v1738_v33 = vld [vmem:[#allocation21_spill] sm:$0xff] }
  0xbf   :  { %325 = vadd.xlane.f32.xlu2 %v324_v25  ;;  %317 = vadd.xlane.f32.xlu0 %v316_v8  ;;  %v331_v9 = vadd.f32 %v330_v55, %v329_v19  ;;  %v514_v37 = vmul.f32 %v1726_v61, %v493_v18  ;;  %v515_v15 = vmul.f32 %v1727_v58, %v494_v46  ;;  %v1735_v8 = vld [vmem:[#allocation27_spill] sm:$0xff] }
  0xc0   :  { %v501_v24 = vsub.f32 %v1729_v31, %v1728_v10  ;;  %v541_v26 = vadd.f32 %v518_v57, %v517_v13  ;;  %v495_v54 = vsub.f32 %v1731_v35, %v1730_v34  ;;  %v545_v32 = vadd.f32 %v521_v3, %v520_v63 }
  0xc1   :  { %v526_v0 = vmul.f32 %v1338_v14, %v505_v30  ;;  %v527_v25 = vmul.f32 %v1342_v16, %v506_v47  ;;  %v502_v17 = vsub.f32 %v1732_v53, %v1319_v38  ;;  %v503_v23 = vsub.f32 %v1733_v41, %v1322_v5 }
  0xc2   :  { %v519_v39 = vmul.f32 %v1734_v6, %v498_v12  ;;  %v537_v59 = vadd.f32 %v515_v15, %v514_v37  ;;  %v507_v45 = vsub.f32 %v1735_v8, %v1363_v43  ;;  %v522_v51 = vmul.f32 %v1236_v4, %v501_v24  ;;  %v1737_v4 = vld [vmem:[#allocation30_spill] sm:$0xff] }
  0xc3   :  { %v516_v20 = vmul.f32 %v1736_v44, %v495_v54  ;;  %v553_v16 = vsel %vm232_vm1, %v526_v0, 0.0  ;;  %v554_v7 = vsel %vm232_vm1, %v527_v25, 0.0  ;;  %v523_v5 = vmul.f32 %v1264_v29, %v502_v17 }
  0xc4   :  { %v542_v11 = vadd.f32 %v541_v26, %v519_v39  ;;  %v546_v14 = vadd.f32 %v545_v32, %v522_v51  ;;  %v524_v36 = vmul.f32 %v1287_v40, %v503_v23  ;;  %v528_v56 = vmul.f32 %v1349_v52, %v507_v45 }
  0xc5   :  { %v538_v38 = vadd.f32 %v537_v59, %v516_v20  ;;  %v555_v43 = vadd.f32 %v554_v7, %v553_v16  ;;  %v504_v22 = vsub.f32 %v1738_v33, %v1737_v4 }
  0xc6   :  { %531 = vadd.xlane.f32.xlu1 %v530_v49  ;;  %v549_v27 = vadd.f32 %v524_v36, %v523_v5  ;;  %v556_v18 = vsel %vm232_vm1, %v528_v56, 0.0 }
  0xc7   :  { %535 = vadd.xlane.f32.xlu2 %v534_v42  ;;  %332 = vadd.xlane.f32.xlu0 %v331_v9  ;;  %v557_v46 = vadd.f32 %v556_v18, %v555_v43  ;;  %v525_v48 = vmul.f32 %v1293_v50, %v504_v22 }
  0xc9   :  { %v550_v19 = vadd.f32 %v549_v27, %v525_v48 }
  0xce   :  { %543 = vadd.xlane.f32.xlu1 %v542_v11 }
  0xcf   :  { %547 = vadd.xlane.f32.xlu2 %v546_v14  ;;  %539 = vadd.xlane.f32.xlu0 %v538_v38 }
  0xd6   :  { %558 = vadd.xlane.f32.xlu1 %v557_v46 }
  0xd7   :  { %551 = vadd.xlane.f32.xlu0 %v550_v19 }
 0x10c   :  { %v1444_v40 = vpop.xlane.xlu1 %452 }
 0x10d   :  { %836 = vrcp.f32 %v1444_v40  ;;  %v599_v3 = vand.u32 2147483647, %v1444_v40  ;;  %v601_v9 = vand.u32 2147483648, %v1444_v40  ;;  %vm595_vm2 = vweird.f32 %v1444_v40 }
 0x10f   :  { %vm1486_vm3 = vcmp.eq.f32.partialorder %v599_v3, 8.507059e+37  ;;  %v602_v34 = vor.u32 1.1754944e-38, %v601_v9 }
 0x110   :  { %v1442_v29 = vpop.xlane.xlu2 %444 }
 0x111   :  { %838 = vrcp.f32 %v1442_v29  ;;  %v571_v12 = vand.u32 2147483648, %v1442_v29  ;;  %v569_v31 = vand.u32 2147483647, %v1442_v29  ;;  %vm565_vm4 = vweird.f32 %v1442_v29 }
 0x113   :  { %v1453_v55 = vpop.eup %836  ;;  %v1492_v54 = vor.u32 1.1754944e-38, %v571_v12  ;;  %vm1508_vm7 = vcmp.eq.f32.partialorder %v569_v31, 8.507059e+37 }
 0x114   :  { %v591_v30 = vmul.f32 %v1453_v55, %v1444_v40  ;;  %vm596_vm5 = vweird.f32 %v1453_v55 }
 0x115   :  { %vm1526_vm8 = vmor %vm595_vm2, %vm596_vm5 }
 0x116   :  { %v592_v62 = vsub.f32 1.0, %v591_v30 }
 0x117   :  { %v1460_v28 = vpop.eup %838 }
 0x118   :  { %v1446_v21 = vpop.xlane.xlu2 %456  ;;  %v561_v57 = vmul.f32 %v1460_v28, %v1442_v29  ;;  %v593_v58 = vmul.f32 %v1453_v55, %v592_v62  ;;  %vm566_vm6 = vweird.f32 %v1460_v28 }
 0x119   :  { %v614_v25 = vand.u32 2147483647, %v1446_v21  ;;  %v616_v23 = vand.u32 2147483648, %v1446_v21  ;;  %vm610_vm9 = vweird.f32 %v1446_v21  ;;  %vm1555_vm15 = vmor %vm565_vm4, %vm566_vm6 }
 0x11a   :  { %v1449_v52 = vpop.xlane.xlu0 %448  ;;  %v562_v37 = vsub.f32 1.0, %v561_v57  ;;  %v594_v53 = vadd.f32 %v1453_v55, %v593_v58 }
 0x11b   :  { %840 = vrcp.f32 %v1449_v52  ;;  %v584_v59 = vand.u32 2147483647, %v1449_v52  ;;  %v586_v44 = vand.u32 2147483648, %v1449_v52  ;;  %vm1532_vm10 = vcmp.eq.f32.partialorder %v614_v25, 8.507059e+37 }
 0x11c   :  { %842 = vrcp.f32 %v1446_v21  ;;  %v563_v0 = vmul.f32 %v1460_v28, %v562_v37  ;;  %v598_v5 = vsel %vm1526_vm8, %v1453_v55, %v594_v53  ;;  %vm580_vm11 = vweird.f32 %v1449_v52 }
 0x11d   :  { %844 = vlog2.f32 %v1444_v40  ;;  %v617_v43 = vor.u32 1.1754944e-38, %v616_v23  ;;  %vm1545_vm13 = vcmp.eq.f32.partialorder %v584_v59, 8.507059e+37  ;;  %v587_v46 = vor.u32 1.1754944e-38, %v586_v44 }
 0x11e   :  { %846 = vlog2.f32 %v1442_v29  ;;  %v564_v7 = vadd.f32 %v1460_v28, %v563_v0  ;;  %v1561_v19 = vsel %vm1486_vm3, %v602_v34, %v598_v5  ;;  %vm693_vm3 = vcmask 7168  }
 0x120   :  { %v310_v50 = vpop.xlane.xlu2 %309 }
 0x121   :  { %v306_v60 = vpop.xlane.xlu1 %305  ;;  %v1462_v13 = vpop.eup %840 }
 0x122   :  { %v1458_v49 = vpop.xlane.xlu0 %460  ;;  %v1464_v1 = vpop.eup %842  ;;  %v576_v47 = vmul.f32 %v1462_v13, %v1449_v52  ;;  %vm581_vm12 = vweird.f32 %v1462_v13 }
 0x123   :  { %v606_v42 = vmul.f32 %v1464_v1, %v1446_v21  ;;  %848 = vrcp.f32 %v1458_v49  ;;  %v845_v10 = vpop.eup %844  ;;  %vm611_vm14 = vweird.f32 %v1464_v1  ;;  %vm1572_vm1 = vmor %vm580_vm11, %vm581_vm12  ;;  %v629_v62 = vand.u32 2147483647, %v1458_v49 }
 0x124   :  { %v577_v15 = vsub.f32 1.0, %v576_v47  ;;  %850 = vlog2.f32 %v1446_v21  ;;  %v847_v35 = vpop.eup %846  ;;  %v1500_v17 = vmul.f32 0.6931472, %v845_v10  ;;  %vm1589_vm2 = vmor %vm610_vm9, %vm611_vm14  ;;  %vm625_vm4 = vweird.f32 %v1458_v49 }
 0x125   :  { %v607_v24 = vsub.f32 1.0, %v606_v42  ;;  %v1514_v45 = vmul.f32 0.6931472, %v847_v35  ;;  %vm1609_vm5 = vcmp.eq.f32.partialorder %v629_v62, 8.507059e+37 }
 0x126   :  { %v578_v41 = vmul.f32 %v1462_v13, %v577_v15 }
 0x127   :  { %v608_v8 = vmul.f32 %v1464_v1, %v607_v24 }
 0x128   :  { %v579_v56 = vadd.f32 %v1462_v13, %v578_v41 }
 0x129   :  { %v1475_v63 = vpop.xlane.xlu1 %321  ;;  %v1495_v32 = vpop.eup %848  ;;  %v609_v22 = vadd.f32 %v1464_v1, %v608_v8 }
 0x12a   :  { %v314_v2 = vpop.xlane.xlu2 %313  ;;  %v1480_v61 = vpop.xlane.xlu0 %464  ;;  %v621_v51 = vmul.f32 %v1495_v32, %v1458_v49  ;;  %vm626_vm6 = vweird.f32 %v1495_v32 }
 0x12b   :  { %852 = vrcp.f32 %v1480_v61  ;;  %v851_v14 = vpop.eup %850  ;;  %vm1624_vm8 = vmor %vm625_vm4, %vm626_vm6  ;;  %v646_v5 = vand.u32 2147483648, %v1480_v61 }
 0x12c   :  { %854 = vlog2.f32 %v310_v50  ;;  %v622_v48 = vsub.f32 1.0, %v621_v51  ;;  %v568_v50 = vsel %vm1555_vm15, %v1460_v28, %v564_v7  ;;  %v1580_v57 = vmul.f32 0.6931472, %v851_v14 }
 0x12d   :  { %856 = vlog2.f32 %v306_v60  ;;  %v631_v60 = vand.u32 2147483648, %v1458_v49  ;;  %v583_v28 = vsel %vm1572_vm1, %v1462_v13, %v579_v56  ;;  %v613_v13 = vsel %vm1589_vm2, %v1464_v1, %v609_v22 }
 0x12e   :  { %858 = vlog2.f32 %v1449_v52  ;;  %v573_v21 = vsel %vm1508_vm7, %v1492_v54, %v568_v50  ;;  %v623_v12 = vmul.f32 %v1495_v32, %v622_v48  ;;  %v588_v58 = vsel %vm1545_vm13, %v587_v46, %v583_v28 }
 0x12f   :  { %v632_v10 = vor.u32 1.1754944e-38, %v631_v60  ;;  %v618_v35 = vsel %vm1532_vm10, %v617_v43, %v613_v13  ;;  %vm640_vm7 = vweird.f32 %v1480_v61  ;;  %v644_v14 = vand.u32 2147483647, %v1480_v61 }
 0x130   :  { %v624_v59 = vadd.f32 %v1495_v32, %v623_v12  ;;  %vm705_vm1 = vcmask 1024  }
 0x131   :  { %v1505_v6 = vpop.xlane.xlu1 %471  ;;  %v1539_v36 = vpop.eup %852  ;;  %vm1655_vm13 = vcmp.eq.f32.partialorder %v644_v14, 8.507059e+37 }
 0x132   :  { %860 = vrcp.f32 %v1505_v6  ;;  %v1519_v11 = vpop.xlane.xlu2 %325  ;;  %v318_v16 = vpop.xlane.xlu0 %317  ;;  %v636_v55 = vmul.f32 %v1539_v36, %v1480_v61  ;;  %vm655_vm10 = vweird.f32 %v1505_v6  ;;  %v661_v46 = vand.u32 2147483648, %v1505_v6 }
 0x133   :  { %v855_v4 = vpop.eup %854  ;;  %862 = vlog2.f32 %v1458_v49  ;;  %v659_v49 = vand.u32 2147483647, %v1505_v6  ;;  %vm641_vm11 = vweird.f32 %v1539_v36 }
 0x134   :  { %v857_v27 = vpop.eup %856  ;;  %864 = vlog2.f32 %v314_v2  ;;  %v337_v47 = vmul.f32 0.6931472, %v855_v4  ;;  %v637_v24 = vsub.f32 1.0, %v636_v55  ;;  %v628_v4 = vsel %vm1624_vm8, %v1495_v32, %v624_v59  ;;  %vm642_vm15 = vmor %vm640_vm7, %vm641_vm11 }
 0x135   :  { %v859_v40 = vpop.eup %858  ;;  %866 = vlog2.f32 %v318_v16  ;;  %v335_v42 = vmul.f32 0.6931472, %v857_v27  ;;  %v633_v60 = vsel %vm1609_vm5, %v632_v10, %v628_v4  ;;  %vm660_vm14 = vcmp.eq.f32.partialorder %v659_v49, 8.507059e+37  ;;  %v1765_v4 = vld [vmem:[#allocation11_spill] sm:$0xff] }
 0x136   :  { %868 = vlog2.f32 %v1475_v63  ;;  %v476_v9 = vmul.f32 0.6931472, %v859_v40  ;;  %v638_v51 = vmul.f32 %v1539_v36, %v637_v24 }
 0x137   :  { %870 = vlog2.f32 %v1480_v61  ;;  %v665_v53 = vsub.f32 %v335_v42, %v1514_v45 }
 0x138   :  { %v1577_v30 = vpop.eup %860  ;;  %v666_v25 = vsub.f32 %v337_v47, %v476_v9  ;;  %v639_v48 = vadd.f32 %v1539_v36, %v638_v51 }
 0x139   :  { %v651_v63 = vmul.f32 %v1577_v30, %v1505_v6  ;;  %v532_v3 = vpop.xlane.xlu1 %531  ;;  %v863_v37 = vpop.eup %862  ;;  %vm656_vm9 = vweird.f32 %v1577_v30 }
 0x13a   :  { %v536_v2 = vpop.xlane.xlu2 %535  ;;  %v333_v15 = vpop.xlane.xlu0 %332  ;;  %v574_v1 = vmul.f32 %v573_v21, %v532_v3  ;;  %v482_v39 = vmul.f32 0.6931472, %v863_v37  ;;  %vm1646_vm12 = vmor %vm655_vm10, %vm656_vm9  ;;  %v662_v3 = vor.u32 1.1754944e-38, %v661_v46  ;;  %v643_v21 = vsel %vm642_vm15, %v1539_v36, %v639_v48 }
 0x13b   :  { %v652_v31 = vsub.f32 1.0, %v651_v63  ;;  %v865_v26 = vpop.eup %864  ;;  %v589_v34 = vmul.f32 %v588_v58, %v536_v2  ;;  %872 = vlog2.f32 %v333_v15  ;;  %v647_v15 = vor.u32 1.1754944e-38, %v646_v5 }
 0x13c   :  { %v867_v0 = vpop.eup %866  ;;  %874 = vlog2.f32 %v1519_v11  ;;  %v339_v8 = vmul.f32 0.6931472, %v865_v26  ;;  %v672_v45 = vadd.f32 %v665_v53, %v574_v1 }
 0x13d   :  { %v653_v41 = vmul.f32 %v1577_v30, %v652_v31  ;;  %v869_v23 = vpop.eup %868  ;;  %876 = vlog2.f32 %v1505_v6  ;;  %v341_v44 = vmul.f32 0.6931472, %v867_v0  ;;  %v673_v20 = vadd.f32 %v666_v25, %v589_v34 }
 0x13e   :  { %v343_v16 = vmul.f32 0.6931472, %v869_v23  ;;  %v871_v56 = vpop.eup %870  ;;  %v667_v22 = vsub.f32 %v339_v8, %v1500_v17  ;;  %v694_v32 = vsel %vm693_vm3, %v672_v45, 0.0  ;;  %v648_v61 = vsel %vm1655_vm13, %v647_v15, %v643_v21 }
 0x13f   :  { %v654_v38 = vadd.f32 %v1577_v30, %v653_v41  ;;  %v668_v55 = vsub.f32 %v341_v44, %v1580_v57  ;;  %v695_v50 = vsel %vm693_vm3, %v673_v20, 0.0  ;;  %v484_v2 = vmul.f32 0.6931472, %v871_v56 }
 0x140   :  { %v669_v42 = vsub.f32 %v343_v16, %v482_v39  ;;  %v696_v63 = vadd.f32 %v695_v50, %v694_v32  ;;  %v960_v34 = vmov 0.0   ;;  %v1764_v56 = vlaneseq }
 0x141   :  { %v544_v7 = vpop.xlane.xlu1 %543  ;;  %v873_v33 = vpop.eup %872  ;;  %v658_v57 = vsel %vm1646_vm12, %v1577_v30, %v654_v38  ;;  %v743_v54 = vsel %vm151_vm0, 1.0, %v960_v34  ;;  %vm719_vm0 = vcmp.eq.s32.totalorder %v1765_v4, 0 }
 0x142   :  { %v619_v43 = vmul.f32 %v618_v35, %v544_v7  ;;  %v548_v27 = vpop.xlane.xlu2 %547  ;;  %v540_v18 = vpop.xlane.xlu0 %539  ;;  %v347_v52 = vmul.f32 0.6931472, %v873_v33  ;;  %v663_v37 = vsel %vm660_vm14, %v662_v3, %v658_v57 }
 0x143   :  { %v875_v40 = vpop.eup %874  ;;  %v604_v29 = vmul.f32 %v1561_v19, %v540_v18  ;;  %v634_v62 = vmul.f32 %v633_v60, %v548_v27 }
 0x144   :  { %v877_v6 = vpop.eup %876  ;;  %v675_v19 = vadd.f32 %v668_v55, %v619_v43  ;;  %v345_v13 = vmul.f32 0.6931472, %v875_v40  ;;  %v718_v43 = vand.u32 127, %v1764_v56 }
 0x145   :  { %v674_v47 = vadd.f32 %v667_v22, %v604_v29  ;;  %v486_v9 = vmul.f32 0.6931472, %v877_v6  ;;  %v676_v24 = vadd.f32 %v669_v42, %v634_v62 }
 0x146   :  { %v699_v31 = vsel %vm693_vm3, %v675_v19, 0.0  ;;  %v670_v36 = vsub.f32 %v345_v13, %v484_v2  ;;  %vm720_vm2 = vcmp.eq.s32.totalorder %v718_v43, 0 }
 0x147   :  { %v697_v30 = vsel %vm693_vm3, %v674_v47, 0.0  ;;  %v671_v10 = vsub.f32 %v347_v52, %v486_v9  ;;  %v701_v41 = vsel %vm693_vm3, %v676_v24, 0.0 }
 0x148   :  { %v698_v12 = vadd.f32 %v697_v30, %v696_v63 }
 0x149   :  { %v559_v58 = vpop.xlane.xlu1 %558 }
 0x14a   :  { %v664_v26 = vmul.f32 %v663_v37, %v559_v58  ;;  %v552_v1 = vpop.xlane.xlu0 %551  ;;  %v700_v0 = vadd.f32 %v699_v31, %v698_v12 }
 0x14b   :  { %v649_v53 = vmul.f32 %v648_v61, %v552_v1 }
 0x14c   :  { %v678_v25 = vadd.f32 %v671_v10, %v664_v26  ;;  %v702_v59 = vadd.f32 %v701_v41, %v700_v0 }
 0x14d   :  { %v677_v23 = vadd.f32 %v670_v36, %v649_v53 }
 0x14e   :  { %v692_v39 = vmul.f32 %v743_v54, %v678_v25 }
 0x14f   :  { %v703_v8 = vsel %vm693_vm3, %v677_v23, 0.0  ;;  %vm721_vm3 = vmand %vm719_vm0, %vm720_vm2 }
 0x150   :  { %v706_v51 = vsel %vm705_vm1, %v692_v39, 0.0  ;;  %v704_v44 = vadd.f32 %v703_v8, %v702_v59 }
 0x152   :  { %v707_v45 = vadd.f32 %v706_v51, %v704_v44 }
 0x154   :  { %708 = vadd.xlane.f32.xlu2 %v707_v45 }
 0x1c7   :  { %v709_v20 = vpop.xlane.xlu2 %708 }
 0x1c8   :  { %v710_v14 = vrot.slane %v709_v20, 4 }
 0x1ca   :  { %v711_v16 = vadd.f32 %v710_v14, %v709_v20 }
 0x1cc   :  { %v712_v7 = vrot.slane %v711_v16, 2 }
 0x1ce   :  { %v713_v11 = vadd.f32 %v712_v7, %v711_v16 }
 0x1d0   :  { %v714_v38 = vrot.slane %v713_v11, 1 }
 0x1d2   :  { %v715_v5 = vadd.f32 %v714_v38, %v713_v11 }
 0x1d4   :  { %744 = vpush %v715_v5 }
 0x205   :  { %s745_s24 = spop %744 }
 0x206   :  { %v722_v49 = vstv %s745_s24 }
 0x207   :  { %v723_v33 = vsel %vm721_vm3, %v722_v49, 0.0 }
 0x208   :  { %724 = vst [vmem:[#allocation7] sm:$0xff] %v723_v33 }
 0x209   :  { %735 = dma.vmem_to_hbm [thread:$0]  %s731_s1, 128, %s733_s23, [#allocation4]  }
 0x20a   :  { %954 = dma.done.wait [#allocation4], 128  }
 0x20b   :  { %955 = vsyncadd [#allocation4], 4294967168 }
 0x20c   :  { %740 = vsyncpa [#allocation3], 1 }
 0x20d   :  { %741 = vsyncpa [#allocation6], 1 }
 0x20e   :  { %742 = vsyncpa [#allocation4], 1 }

</bundles_post_ra>
